<compile_context>
chip_gen: v7x
topology: tpu7x:2x2x1
jax: 0.10.0
libtpu: 0.0.40
codegen_flags: <defaults>
</compile_context>

<pallas_src>
import math
import string

import jax
import jax.numpy as jnp
from jax.experimental import pallas as pl
from jax.experimental.pallas import tpu as pltpu


def _round_up(x, m):
    return ((x + m - 1) // m) * m


def _vmem_limit_bytes():
    """Scoped-VMEM budget per chip generation (conservative fallback)."""
    cap = None
    try:
        info = pltpu.get_tpu_info()
        cap = getattr(info, "vmem_capacity_bytes", None)
    except Exception:
        cap = None
    if not cap:
        cap = 64 * 1024 * 1024            # assume the smallest (v7x per-TC) VMEM
    if cap >= 128 * 1024 * 1024:          # v5e / v6e
        return 64 * 1024 * 1024
    return 44 * 1024 * 1024               # v7x-class: leave headroom in 64 MiB


def _pad_and_tile(dim, target, align):
    """Return (padded_dim, tile).

    Pads `dim` to a multiple of `align` unless dim < align (full-extent block,
    exempt from the (8,128) rule), then picks the largest aligned tile <=
    target that evenly divides the padded extent -- so a dimension is never
    rounded up to a full tile multiple (avoids up to ~2x wasted HBM traffic).
    """
    if dim < align:
        return dim, dim
    p = _round_up(dim, align)
    t = max(min((target // align) * align, p), align)
    while p % t:
        t -= align
    return p, t


def _tr_kernel_single(x_ref, w_ref, o_ref):
    # Whole (sub)problem is VMEM-resident: one MXU GEMM + "+1" bias, no
    # accumulator scratch, no init/finalize branches.
    o_ref[...] = (
        jnp.dot(x_ref[...], w_ref[...], preferred_element_type=jnp.float32)
        + 1.0
    ).astype(o_ref.dtype)


def _tr_kernel_tiled(x_ref, w_ref, o_ref, acc_ref):
    # grid = (M tiles, N tiles, K tiles); K (reduction) is innermost.
    k = pl.program_id(2)

    @pl.when(k == 0)
    def _():
        acc_ref[...] = jnp.zeros_like(acc_ref)

    acc_ref[...] += jnp.dot(
        x_ref[...], w_ref[...], preferred_element_type=jnp.float32
    )

    @pl.when(k == pl.num_programs(2) - 1)
    def _():
        o_ref[...] = (acc_ref[...] + 1.0).astype(o_ref.dtype)


def tensor_regression_nod(
    x,
    W,
    *,
    tm=512,
    tn=512,
    tk=2048,
    small_vmem_bytes=24 * 1024 * 1024,
    compute_dtype=None,
):
    """y = einsum(x[b, i...], W[i..., o...]) + 1, via a Pallas GEMM kernel."""
    B = x.shape[0]
    in_dims = tuple(x.shape[1:])
    out_dims = tuple(W.shape[len(in_dims):])

    K = math.prod(in_dims) if in_dims else 1
    O = math.prod(out_dims) if out_dims else 1

    out_dtype = x.dtype
    x2 = x.reshape(B, K)
    w2 = W.reshape(K, O)
    if compute_dtype is not None:
        # Accuracy/speed knob (e.g. jnp.bfloat16): halves HBM traffic for W and
        # runs the MXU at native rate.  Accumulation stays f32.
        x2 = x2.astype(compute_dtype)
        w2 = w2.astype(compute_dtype)

    itemsize = jnp.dtype(x2.dtype).itemsize
    sub_align = max(8, 32 // itemsize)      # dtype-aware sublane multiple

    vmem_limit = _vmem_limit_bytes()
    cparams_kwargs = dict(vmem_limit_bytes=vmem_limit)
    budget = vmem_limit - 4 * 1024 * 1024   # headroom for misc scratch

    # Footprint of the no-tiling path, including Pallas's default 2x buffering.
    single_bytes = 2 * (B * K + K * O + B * O) * itemsize
    single_step = single_bytes <= min(small_vmem_bytes, budget)

    if single_step:
        # No padding: full-extent blocks are exempt from the (8,128) rule, so
        # tiny K/O dims don't force an HBM-materialized jnp.pad.  Split N in
        # two (when lane-aligned) so v7x's second TensorCore gets work.
        n_split = 2 if (O >= 256 and O % 256 == 0) else 1
        On = O // n_split

        in_specs = [
            pl.BlockSpec((B, K), lambda j: (0, 0)),
            pl.BlockSpec((K, On), lambda j: (0, j)),
        ]
        out_specs = pl.BlockSpec((B, On), lambda j: (0, j))

        cost = pl.CostEstimate(
            flops=2 * B * K * O,
            transcendentals=0,
            bytes_accessed=(B * K + K * O + 2 * B * O) * itemsize,
        )
        out = pl.pallas_call(
            _tr_kernel_single,
            out_shape=jax.ShapeDtypeStruct((B, O), out_dtype),
            grid_spec=pltpu.PrefetchScalarGridSpec(
                num_scalar_prefetch=0,
                grid=(n_split,),
                in_specs=in_specs,
                out_specs=out_specs,
            ),
            compiler_params=pltpu.CompilerParams(
                dimension_semantics=("parallel",), **cparams_kwargs
            ),
            cost_estimate=cost,
        )(x2, w2)
        return out.reshape((B,) + out_dims)

    # --------------------------- M/N/K-tiled path ---------------------------
    Bp, tm_ = _pad_and_tile(B, tm, sub_align)
    Kp, tk_ = _pad_and_tile(K, tk, 128)
    Op, tn_ = _pad_and_tile(O, tn, 128)

    def _footprint(a, b, c):
        # 2x double-buffered x tile + 2x W tile + 2x out tile + f32 acc.
        return (2 * (a * c + c * b) * itemsize
                + 2 * a * b * itemsize + a * b * 4)

    # Shrink tiles (reduction dim first) until the working set fits the budget.
    while _footprint(tm_, tn_, tk_) > budget:
        if tk_ > 128:
            Kp, tk_ = _pad_and_tile(K, max(tk_ // 2, 128), 128)
        elif tn_ > 128:
            Op, tn_ = _pad_and_tile(O, max(tn_ // 2, 128), 128)
        elif tm_ > sub_align:
            Bp, tm_ = _pad_and_tile(B, max(tm_ // 2, sub_align), sub_align)
        else:
            break

    # Zero-padding is exact: padded K contributes 0 to the dot, and padded
    # rows/cols (with their +1 bias) are sliced off before the final reshape.
    if (Bp, Kp) != (B, K):
        x2 = jnp.pad(x2, ((0, Bp - B), (0, Kp - K)))
    if (Kp, Op) != (K, O):
        w2 = jnp.pad(w2, ((0, Kp - K), (0, Op - O)))

    grid = (Bp // tm_, Op // tn_, Kp // tk_)
    cost = pl.CostEstimate(
        flops=2 * Bp * Kp * Op,
        transcendentals=0,
        bytes_accessed=(Bp * Kp * grid[1] + Kp * Op * grid[0] + Bp * Op)
        * itemsize,
    )
    out = pl.pallas_call(
        _tr_kernel_tiled,
        out_shape=jax.ShapeDtypeStruct((Bp, Op), out_dtype),
        grid_spec=pltpu.PrefetchScalarGridSpec(
            num_scalar_prefetch=0,
            grid=grid,
            in_specs=[
                pl.BlockSpec((tm_, tk_), lambda i, j, k: (i, k)),
                pl.BlockSpec((tk_, tn_), lambda i, j, k: (k, j)),
            ],
            out_specs=pl.BlockSpec((tm_, tn_), lambda i, j, k: (i, j)),
            scratch_shapes=[pltpu.VMEM((tm_, tn_), jnp.float32)],
        ),
        compiler_params=pltpu.CompilerParams(
            dimension_semantics=("parallel", "parallel", "arbitrary"),
            **cparams_kwargs,
        ),
        cost_estimate=cost,
    )(x2, w2)

    return out[:B, :O].reshape((B,) + out_dims)


def _reference_einsum_string(dim, n):
    # Same string generation as the PyTorch module (for the pure-JAX check).
    letters = string.ascii_lowercase
    letters_shifted = letters[1:dim + 1] + letters[0]
    return (letters[:dim - n + 1] + ',' + letters_shifted[:dim]
            + '->' + letters[0] + letters_shifted[dim - n:dim])


def _run_case(key, input_shape, output_shape, atol, rtol, **kwargs):
    shape_w = tuple(input_shape[1:]) + tuple(output_shape[1:])
    N = len(shape_w)
    n = len(output_shape) - 1

    kx, kw = jax.random.split(key)
    x = jax.random.normal(kx, input_shape, dtype=jnp.float32)
    W = jax.random.normal(kw, shape_w, dtype=jnp.float32)

    y = jax.block_until_ready(tensor_regression_nod(x, W, **kwargs))

    eq = _reference_einsum_string(N, n)
    y_ref = jnp.einsum(eq, x, W) + 1.0

    assert y.shape == tuple(output_shape), (y.shape, output_shape)
    assert jnp.allclose(y, y_ref, atol=atol, rtol=rtol), "mismatch vs reference"


if __name__ == "__main__":
    key = jax.random.PRNGKey(0)
    k1, k2, k3 = jax.random.split(key, 3)

    # Case 1: module-example shapes -> single-step, unsplit, fully unpadded.
    #   input (2, 4, 16, 16), output (2, 8)  => K=1024, O=8 ("abcd,bcde->ae")
    _run_case(k1, (2, 4, 16, 16), (2, 8), atol=1e-3, rtol=1e-3)

    # Case 2: medium shapes -> single-step path with the 2-way N split
    #   (megacore on v7x).  input (16, 8, 32, 16), output (16, 64, 8).
    _run_case(k2, (16, 8, 32, 16), (16, 64, 8), atol=1e-2, rtol=1e-2)

    # Case 3: same shapes, but force the M/N/K-tiled accumulator path so it is
    #   exercised and checked too (small_vmem_bytes=0).
    _run_case(k3, (16, 8, 32, 16), (16, 64, 8), atol=1e-2, rtol=1e-2,
              small_vmem_bytes=0)

    print("KERNEL_OK")
</pallas_src>

<mosaic_0001>
module attributes {stable_mosaic.version = 11 : i64} {
  func.func @_tr_kernel_single(%arg0: i32, %arg1: memref<2x1024xf32, #tpu.memory_space<vmem>>, %arg2: memref<1024x8xf32, #tpu.memory_space<vmem>>, %arg3: memref<2x8xf32, #tpu.memory_space<vmem>>) attributes {dimension_semantics = [#tpu.dimension_semantics<parallel>], iteration_bounds = array<i64: 1>, scalar_prefetch = 0 : i64, scratch_operands = 0 : i64, tpu.core_type = #tpu.core_type<tc>, window_params = [{pipeline_mode = #tpu.pipeline_mode<synchronous>, transform_indices = @transform_0, window_bounds = array<i64: 2, 1024>}, {transform_indices = @transform_1, window_bounds = array<i64: 1024, 8>}, {transform_indices = @transform_2, window_bounds = array<i64: 2, 8>}]} {
    %c0 = arith.constant 0 : index
    %c0_0 = arith.constant 0 : index
    %0 = vector.load %arg1[%c0, %c0_0] : memref<2x1024xf32, #tpu.memory_space<vmem>>, vector<2x1024xf32>
    %c0_1 = arith.constant 0 : index
    %c0_2 = arith.constant 0 : index
    %1 = vector.load %arg2[%c0_1, %c0_2] : memref<1024x8xf32, #tpu.memory_space<vmem>>, vector<1024x8xf32>
    %cst = arith.constant dense<0.000000e+00> : vector<2x8xf32>
    %2 = tpu.matmul %0, %1, %cst {dimension_numbers = #tpu.dot_dimension_numbers<[1], [0], [0], [1], [0, 0, 1, 1], [], []>} : vector<2x1024xf32>, vector<1024x8xf32>, vector<2x8xf32> -> vector<2x8xf32>
    %cst_3 = arith.constant 1.000000e+00 : f32
    %3 = vector.broadcast %cst_3 : f32 to vector<2x8xf32>
    %4 = arith.addf %2, %3 : vector<2x8xf32>
    %c0_4 = arith.constant 0 : index
    %c0_5 = arith.constant 0 : index
    %5 = vector.load %arg3[%c0_4, %c0_5] : memref<2x8xf32, #tpu.memory_space<vmem>>, vector<2x8xf32>
    tpu.vector_store %arg3[%c0_4, %c0_5], %4 {strides = array<i32>} : memref<2x8xf32, #tpu.memory_space<vmem>>, vector<2x8xf32>,
    return
  }
  func.func @transform_0(%arg0: i32) -> (i32, i32) {
    %c0_i32 = arith.constant 0 : i32
    %c0_i32_0 = arith.constant 0 : i32
    %c0_i32_1 = arith.constant 0 : i32
    return %c0_i32, %c0_i32_0 : i32, i32
  }
  func.func @transform_1(%arg0: i32) -> (i32, i32) {
    %c0_i32 = arith.constant 0 : i32
    %c0_i32_0 = arith.constant 0 : i32
    return %c0_i32, %arg0 : i32, i32
  }
  func.func @transform_2(%arg0: i32) -> (i32, i32) {
    %c0_i32 = arith.constant 0 : i32
    %c0_i32_0 = arith.constant 0 : i32
    return %c0_i32, %arg0 : i32, i32
  }
}

</mosaic_0001>

<bundles_post_ra>
// kernel: tpu_custom_call.1
= control target key start
LH: loop header
LB: loop body
LE: loop exit
PB: predicated region body
PF: predicated region fallthrough
CT: control target
= control target key end

     0   :  { %v778_v47 = vmov 1983009808   ;;  %v148_v49 = vlaneseq  ;;  %s1208_s0 = inlined_call_operand.vmem [shape: f32[2,1024], index: 0, kind: input, shape index: {}]   ;;  %s1209_s1 = inlined_call_operand.vmem [shape: f32[1024,8], index: 1, kind: input, shape index: {}]   ;;  %s1210_s2 = inlined_call_operand.hbm [shape: f32[2,8], index: 2, kind: output, shape index: {}]  }
   0x1   :  { %v30_v0 = vld [vmem:[%s1209_s1 + $0x80] sm:$0xff]  ;;  %v31_v1 = vld [vmem:[%s1209_s1 + $0x88] sm:$0xff]  ;;  %v32_v11 = vld [vmem:[%s1209_s1 + $0x90] sm:$0xff]  ;;  %v146_v48 = vunpack.c.l.s4 %v778_v47 }
   0x2   :  { %v14_v2 = vld [vmem:[%s1209_s1] sm:$0xff]  ;;  %v622_v3 = vpack.c.bf16 %v31_v1, %v30_v0  ;;  %v15_v4 = vld [vmem:[%s1209_s1 + $0x8] sm:$0xff]  ;;  %v33_v13 = vld [vmem:[%s1209_s1 + $0x98] sm:$0xff]  ;;  %v149_v0 = vshrl.u32 %v148_v49, 7 }
   0x3   :  { %v62_v5 = vld [vmem:[%s1209_s1 + $0x180] sm:$0xff]  ;;  %v63_v6 = vld [vmem:[%s1209_s1 + $0x188] sm:$0xff]  ;;  %v624_v7 = vpack.c.bf16 %v15_v4, %v14_v2  ;;  %v16_v14 = vld [vmem:[%s1209_s1 + $0x10] sm:$0xff]  ;;  %v626_v16 = vpack.c.bf16 %v33_v13, %v32_v11  ;;  %v147_v63 = vunpack.c.0.s8 %v146_v48 }
   0x4   :  { %v654_v8 = vpack.c.bf16 %v63_v6, %v62_v5  ;;  %v46_v9 = vld [vmem:[%s1209_s1 + $0x100] sm:$0xff]  ;;  %v47_v10 = vld [vmem:[%s1209_s1 + $0x108] sm:$0xff]  ;;  %623 = vmatprep.subr.bf16.mxu0 %v622_v3  ;;  %v17_v15 = vld [vmem:[%s1209_s1 + $0x18] sm:$0xff] }
   0x5   :  { %v656_v12 = vpack.c.bf16 %v47_v10, %v46_v9  ;;  %625 = vmatpush3.bf16.msra.mxu0 %v624_v7  ;;  %v628_v17 = vpack.c.bf16 %v17_v15, %v16_v14  ;;  %v64_v18 = vld [vmem:[%s1209_s1 + $0x190] sm:$0xff]  ;;  %v65_v19 = vld [vmem:[%s1209_s1 + $0x198] sm:$0xff]  ;;  %v34_v23 = vld [vmem:[%s1209_s1 + $0xa0] sm:$0xff]  ;;  %v945_v13 = vsub.s32 %v147_v63, %v149_v0 }
   0x6   :  { %655 = vmatprep.subr.bf16.mxu1 %v654_v8  ;;  %v48_v20 = vld [vmem:[%s1209_s1 + $0x110] sm:$0xff]  ;;  %v658_v21 = vpack.c.bf16 %v65_v19, %v64_v18  ;;  %v49_v22 = vld [vmem:[%s1209_s1 + $0x118] sm:$0xff]  ;;  %v35_v24 = vld [vmem:[%s1209_s1 + $0xa8] sm:$0xff]  ;;  %627 = vmatprep.subr.bf16.mxu0 %v626_v16 }
   0x7   :  { %657 = vmatpush3.bf16.msra.mxu1 %v656_v12  ;;  %v660_v25 = vpack.c.bf16 %v49_v22, %v48_v20  ;;  %v630_v26 = vpack.c.bf16 %v35_v24, %v34_v23  ;;  %v18_v27 = vld [vmem:[%s1209_s1 + $0x20] sm:$0xff]  ;;  %v19_v28 = vld [vmem:[%s1209_s1 + $0x28] sm:$0xff]  ;;  %v36_v35 = vld [vmem:[%s1209_s1 + $0xb0] sm:$0xff] }
   0x8   :  { %v66_v29 = vld [vmem:[%s1209_s1 + $0x1a0] sm:$0xff]  ;;  %659 = vmatprep.subr.bf16.mxu1 %v658_v21  ;;  %v67_v30 = vld [vmem:[%s1209_s1 + $0x1a8] sm:$0xff]  ;;  %v632_v33 = vpack.c.bf16 %v19_v28, %v18_v27  ;;  %v37_v36 = vld [vmem:[%s1209_s1 + $0xb8] sm:$0xff] }
   0x9   :  { %v50_v31 = vld [vmem:[%s1209_s1 + $0x120] sm:$0xff]  ;;  %v51_v32 = vld [vmem:[%s1209_s1 + $0x128] sm:$0xff]  ;;  %629 = vmatpush3.bf16.msra.mxu0 %v628_v17  ;;  %v662_v34 = vpack.c.bf16 %v67_v30, %v66_v29  ;;  %v20_v37 = vld [vmem:[%s1209_s1 + $0x30] sm:$0xff]  ;;  %v634_v39 = vpack.c.bf16 %v37_v36, %v36_v35 }
   0xa   :  { %631 = vmatprep.subr.bf16.mxu0 %v630_v26  ;;  %v664_v38 = vpack.c.bf16 %v51_v32, %v50_v31  ;;  %v21_v40 = vld [vmem:[%s1209_s1 + $0x38] sm:$0xff]  ;;  %v68_v41 = vld [vmem:[%s1209_s1 + $0x1b0] sm:$0xff]  ;;  %v38_v46 = vld [vmem:[%s1209_s1 + $0xc0] sm:$0xff] }
   0xb   :  { %661 = vmatpush3.bf16.msra.mxu1 %v660_v25  ;;  %v69_v42 = vld [vmem:[%s1209_s1 + $0x1b8] sm:$0xff]  ;;  %v52_v44 = vld [vmem:[%s1209_s1 + $0x130] sm:$0xff]  ;;  %v39_v50 = vld [vmem:[%s1209_s1 + $0xc8] sm:$0xff]  ;;  %v636_v51 = vpack.c.bf16 %v21_v40, %v20_v37 }
   0xc   :  { %663 = vmatprep.subr.bf16.mxu1 %v662_v34  ;;  %v666_v43 = vpack.c.bf16 %v69_v42, %v68_v41  ;;  %v53_v45 = vld [vmem:[%s1209_s1 + $0x138] sm:$0xff]  ;;  %v70_v52 = vld [vmem:[%s1209_s1 + $0x1c0] sm:$0xff]  ;;  %v71_v53 = vld [vmem:[%s1209_s1 + $0x1c8] sm:$0xff]  ;;  %v638_v55 = vpack.c.bf16 %v39_v50, %v38_v46 }
   0xd   :  { %633 = vmatpush3.bf16.msra.mxu0 %v632_v33  ;;  %v668_v54 = vpack.c.bf16 %v53_v45, %v52_v44  ;;  %v22_v56 = vld [vmem:[%s1209_s1 + $0x40] sm:$0xff]  ;;  %v23_v57 = vld [vmem:[%s1209_s1 + $0x48] sm:$0xff]  ;;  %v670_v59 = vpack.c.bf16 %v71_v53, %v70_v52  ;;  %v40_v61 = vld [vmem:[%s1209_s1 + $0xd0] sm:$0xff] }
   0xe   :  { %635 = vmatprep.subr.bf16.mxu0 %v634_v39  ;;  %v54_v58 = vld [vmem:[%s1209_s1 + $0x140] sm:$0xff]  ;;  %v55_v60 = vld [vmem:[%s1209_s1 + $0x148] sm:$0xff]  ;;  %v41_v62 = vld [vmem:[%s1209_s1 + $0xd8] sm:$0xff]  ;;  %v640_v3 = vpack.c.bf16 %v23_v57, %v22_v56 }
   0xf   :  { %665 = vmatpush3.bf16.msra.mxu1 %v664_v38  ;;  %v72_v1 = vld [vmem:[%s1209_s1 + $0x1d0] sm:$0xff]  ;;  %v73_v2 = vld [vmem:[%s1209_s1 + $0x1d8] sm:$0xff]  ;;  %v672_v4 = vpack.c.bf16 %v55_v60, %v54_v58  ;;  %v642_v5 = vpack.c.bf16 %v41_v62, %v40_v61  ;;  %v42_v11 = vld [vmem:[%s1209_s1 + $0xe0] sm:$0xff] }
  0x10   :  { %667 = vmatprep.subr.bf16.mxu1 %v666_v43  ;;  %v24_v6 = vld [vmem:[%s1209_s1 + $0x50] sm:$0xff]  ;;  %v25_v7 = vld [vmem:[%s1209_s1 + $0x58] sm:$0xff]  ;;  %v674_v9 = vpack.c.bf16 %v73_v2, %v72_v1  ;;  %v43_v12 = vld [vmem:[%s1209_s1 + $0xe8] sm:$0xff] }
  0x11   :  { %637 = vmatpush3.bf16.msra.mxu0 %v636_v51  ;;  %v56_v8 = vld [vmem:[%s1209_s1 + $0x150] sm:$0xff]  ;;  %v57_v10 = vld [vmem:[%s1209_s1 + $0x158] sm:$0xff]  ;;  %v74_v14 = vld [vmem:[%s1209_s1 + $0x1e0] sm:$0xff]  ;;  %v644_v16 = vpack.c.bf16 %v25_v7, %v24_v6  ;;  %v646_v19 = vpack.c.bf16 %v43_v12, %v42_v11 }
  0x12   :  { %639 = vmatprep.subr.bf16.mxu0 %v638_v55  ;;  %v75_v15 = vld [vmem:[%s1209_s1 + $0x1e8] sm:$0xff]  ;;  %v26_v17 = vld [vmem:[%s1209_s1 + $0x60] sm:$0xff]  ;;  %v676_v18 = vpack.c.bf16 %v57_v10, %v56_v8  ;;  %v44_v25 = vld [vmem:[%s1209_s1 + $0xf0] sm:$0xff] }
  0x13   :  { %669 = vmatpush3.bf16.msra.mxu1 %v668_v54  ;;  %v27_v20 = vld [vmem:[%s1209_s1 + $0x68] sm:$0xff]  ;;  %v58_v21 = vld [vmem:[%s1209_s1 + $0x160] sm:$0xff]  ;;  %v678_v23 = vpack.c.bf16 %v75_v15, %v74_v14  ;;  %v45_v26 = vld [vmem:[%s1209_s1 + $0xf8] sm:$0xff] }
  0x14   :  { %671 = vmatprep.subr.bf16.mxu1 %v670_v59  ;;  %v12_v22 = vld [vmem:[%s1208_s0] sm:$0xff]  ;;  %v59_v24 = vld [vmem:[%s1209_s1 + $0x168] sm:$0xff]  ;;  %v76_v29 = vld [vmem:[%s1209_s1 + $0x1f0] sm:$0xff]  ;;  %v648_v31 = vpack.c.bf16 %v27_v20, %v26_v17  ;;  %v650_v35 = vpack.c.bf16 %v45_v26, %v44_v25 }
  0x15   :  { %641 = vmatpush3.bf16.msra.mxu0 %v640_v3  ;;  %v151_v27 = vrot.slane %v12_v22, %v945_v13  ;;  %v144_v28 = vcombine.high %v12_v22, %v12_v22  ;;  %v77_v30 = vld [vmem:[%s1209_s1 + $0x1f8] sm:$0xff]  ;;  %v680_v34 = vpack.c.bf16 %v59_v24, %v58_v21  ;;  %v28_v36 = vld [vmem:[%s1209_s1 + $0x70] sm:$0xff]  ;;  %v94_v41 = vld [vmem:[%s1209_s1 + $0x280] sm:$0xff] }
  0x16   :  { %643 = vmatprep.subr.bf16.mxu0 %v642_v5  ;;  %v29_v37 = vld [vmem:[%s1209_s1 + $0x78] sm:$0xff]  ;;  %v60_v38 = vld [vmem:[%s1209_s1 + $0x170] sm:$0xff]  ;;  %v682_v39 = vpack.c.bf16 %v77_v30, %v76_v29  ;;  %v95_v42 = vld [vmem:[%s1209_s1 + $0x288] sm:$0xff] }
  0x17   :  { %673 = vmatpush3.bf16.msra.mxu1 %v672_v4  ;;  %v159_v32 = vcombine.high %v151_v27, %v151_v27  ;;  %v158_v33 = vrot.slane %v144_v28, %v945_v13  ;;  %v61_v40 = vld [vmem:[%s1209_s1 + $0x178] sm:$0xff]  ;;  %v126_v44 = vld [vmem:[%s1209_s1 + $0x380] sm:$0xff]  ;;  %v127_v45 = vld [vmem:[%s1209_s1 + $0x388] sm:$0xff]  ;;  %v652_v46 = vpack.c.bf16 %v29_v37, %v28_v36  ;;  %v686_v48 = vpack.c.bf16 %v95_v42, %v94_v41 }
  0x18   :  { %675 = vmatprep.subr.bf16.mxu1 %v674_v9  ;;  %v684_v47 = vpack.c.bf16 %v61_v40, %v60_v38  ;;  %v78_v49 = vld [vmem:[%s1209_s1 + $0x200] sm:$0xff]  ;;  %v79_v50 = vld [vmem:[%s1209_s1 + $0x208] sm:$0xff]  ;;  %v718_v52 = vpack.c.bf16 %v127_v45, %v126_v44  ;;  %v96_v54 = vld [vmem:[%s1209_s1 + $0x290] sm:$0xff] }
  0x19   :  { %645 = vmatpush3.bf16.msra.mxu0 %v644_v16  ;;  %250 = vmatprep.mubr.f32.mxu0 %v159_v32  ;;  %v160_v43 = vcombine.high %v158_v33, %v158_v33  ;;  %v110_v51 = vld [vmem:[%s1209_s1 + $0x300] sm:$0xff]  ;;  %v111_v53 = vld [vmem:[%s1209_s1 + $0x308] sm:$0xff]  ;;  %v97_v55 = vld [vmem:[%s1209_s1 + $0x298] sm:$0xff]  ;;  %v688_v58 = vpack.c.bf16 %v79_v50, %v78_v49 }
  0x1a   :  { %647 = vmatprep.subr.bf16.mxu0 %v646_v19  ;;  %v128_v56 = vld [vmem:[%s1209_s1 + $0x390] sm:$0xff]  ;;  %v129_v57 = vld [vmem:[%s1209_s1 + $0x398] sm:$0xff]  ;;  %v720_v59 = vpack.c.bf16 %v111_v53, %v110_v51  ;;  %v690_v60 = vpack.c.bf16 %v97_v55, %v96_v54  ;;  %v98_v2 = vld [vmem:[%s1209_s1 + $0x2a0] sm:$0xff] }
  0x1b   :  { %677 = vmatpush3.bf16.msra.mxu1 %v676_v18  ;;  %320 = vmatprep.mubr.f32.mxu1 %v160_v43  ;;  %v80_v61 = vld [vmem:[%s1209_s1 + $0x210] sm:$0xff]  ;;  %v81_v62 = vld [vmem:[%s1209_s1 + $0x218] sm:$0xff]  ;;  %v722_v0 = vpack.c.bf16 %v129_v57, %v128_v56  ;;  %v99_v3 = vld [vmem:[%s1209_s1 + $0x2a8] sm:$0xff] }
  0x1c   :  { %679 = vmatprep.subr.bf16.mxu1 %v678_v23  ;;  %v112_v63 = vld [vmem:[%s1209_s1 + $0x310] sm:$0xff]  ;;  %v113_v1 = vld [vmem:[%s1209_s1 + $0x318] sm:$0xff]  ;;  %v130_v4 = vld [vmem:[%s1209_s1 + $0x3a0] sm:$0xff]  ;;  %v692_v6 = vpack.c.bf16 %v81_v62, %v80_v61  ;;  %v694_v8 = vpack.c.bf16 %v99_v3, %v98_v2 }
  0x1d   :  { %649 = vmatpush3.bf16.msra.mxu0 %v648_v31  ;;  %v131_v5 = vld [vmem:[%s1209_s1 + $0x3a8] sm:$0xff]  ;;  %v724_v7 = vpack.c.bf16 %v113_v1, %v112_v63  ;;  %v82_v9 = vld [vmem:[%s1209_s1 + $0x220] sm:$0xff]  ;;  %v100_v15 = vld [vmem:[%s1209_s1 + $0x2b0] sm:$0xff] }
  0x1e   :  { %651 = vmatprep.subr.bf16.mxu0 %v650_v35  ;;  %v83_v10 = vld [vmem:[%s1209_s1 + $0x228] sm:$0xff]  ;;  %v114_v11 = vld [vmem:[%s1209_s1 + $0x320] sm:$0xff]  ;;  %v726_v12 = vpack.c.bf16 %v131_v5, %v130_v4  ;;  %v101_v16 = vld [vmem:[%s1209_s1 + $0x2b8] sm:$0xff] }
  0x1f   :  { %681 = vmatpush3.bf16.msra.mxu1 %v680_v34  ;;  %v115_v14 = vld [vmem:[%s1209_s1 + $0x328] sm:$0xff]  ;;  %v132_v17 = vld [vmem:[%s1209_s1 + $0x3b0] sm:$0xff]  ;;  %v133_v18 = vld [vmem:[%s1209_s1 + $0x3b8] sm:$0xff]  ;;  %v696_v19 = vpack.c.bf16 %v83_v10, %v82_v9  ;;  %v698_v22 = vpack.c.bf16 %v101_v16, %v100_v15 }
  0x20   :  { %683 = vmatprep.subr.bf16.mxu1 %v682_v39  ;;  %v84_v20 = vld [vmem:[%s1209_s1 + $0x230] sm:$0xff]  ;;  %v728_v21 = vpack.c.bf16 %v115_v14, %v114_v11  ;;  %v85_v23 = vld [vmem:[%s1209_s1 + $0x238] sm:$0xff]  ;;  %v730_v26 = vpack.c.bf16 %v133_v18, %v132_v17  ;;  %v103_v28 = vld [vmem:[%s1209_s1 + $0x2c8] sm:$0xff] }
  0x21   :  { %653 = vmatpush3.bf16.msra.mxu0 %v652_v46  ;;  %v116_v24 = vld [vmem:[%s1209_s1 + $0x330] sm:$0xff]  ;;  %v117_v25 = vld [vmem:[%s1209_s1 + $0x338] sm:$0xff]  ;;  %v134_v29 = vld [vmem:[%s1209_s1 + $0x3c0] sm:$0xff] }
  0x22   :  { %687 = vmatprep.subr.bf16.mxu0 %v686_v48  ;;  %v135_v30 = vld [vmem:[%s1209_s1 + $0x3c8] sm:$0xff] }
  0x23   :  { %685 = vmatpush3.bf16.msra.mxu1 %v684_v47  ;;  %v13_v31 = vld [vmem:[%s1208_s0 + $0x8] sm:$0xff] }
  0x24   :  { %719 = vmatprep.subr.bf16.mxu1 %v718_v52  ;;  %251 = vmatmul.mubr.f32.vlgmr.msra.gmra.mrb[0].mxu0 %v151_v27  ;;  %v102_v27 = vld [vmem:[%s1209_s1 + $0x2c0] sm:$0xff] }
  0x25   :  { %689 = vmatpush3.bf16.msra.mxu0 %v688_v58 }
  0x26   :  { %321 = vmatmul.mubr.f32.vlgmr.msra.gmra.mrb[0].mxu1 %v158_v33  ;;  %691 = vmatprep.subr.bf16.mxu0 %v690_v60 }
  0x27   :  { %721 = vmatpush3.bf16.msra.mxu1 %v720_v59 }
  0x28   :  { %723 = vmatprep.subr.bf16.mxu1 %v722_v0 }
  0x29   :  { %693 = vmatpush3.bf16.msra.mxu0 %v692_v6 }
  0x2a   :  { %695 = vmatprep.subr.bf16.mxu0 %v694_v8 }
  0x2b   :  { %725 = vmatpush3.bf16.msra.mxu1 %v724_v7 }
  0x2c   :  { %727 = vmatprep.subr.bf16.mxu1 %v726_v12 }
  0x2d   :  { %7 = vsyncpa [#allocation3], 0  ;;  %697 = vmatpush3.bf16.msra.mxu0 %v696_v19  ;;  %v700_v32 = vpack.c.bf16 %v85_v23, %v84_v20  ;;  %v1106_v33 = vrot.slane %v13_v31, %v945_v13  ;;  %v161_v34 = vcombine.high %v13_v31, %v13_v31  ;;  %v732_v35 = vpack.c.bf16 %v117_v25, %v116_v24  ;;  %v86_v37 = vld [vmem:[%s1209_s1 + $0x240] sm:$0xff]  ;;  %v87_v38 = vld [vmem:[%s1209_s1 + $0x248] sm:$0xff] }
  0x2e   :  { %699 = vmatprep.subr.bf16.mxu0 %v698_v22  ;;  %v702_v36 = vpack.c.bf16 %v103_v28, %v102_v27  ;;  %v118_v39 = vld [vmem:[%s1209_s1 + $0x340] sm:$0xff]  ;;  %v734_v40 = vpack.c.bf16 %v135_v30, %v134_v29  ;;  %v119_v41 = vld [vmem:[%s1209_s1 + $0x348] sm:$0xff]  ;;  %v104_v42 = vld [vmem:[%s1209_s1 + $0x2d0] sm:$0xff]  ;;  %v704_v48 = vpack.c.bf16 %v87_v38, %v86_v37  ;;  %vm466_vm0 = vcmask 58368  }
  0x2f   :  { %729 = vmatpush3.bf16.msra.mxu1 %v728_v21  ;;  %v105_v43 = vld [vmem:[%s1209_s1 + $0x2d8] sm:$0xff]  ;;  %v176_v44 = vcombine.high %v1106_v33, %v1106_v33  ;;  %v175_v45 = vrot.slane %v161_v34, %v945_v13  ;;  %v136_v46 = vld [vmem:[%s1209_s1 + $0x3d0] sm:$0xff]  ;;  %v736_v50 = vpack.c.bf16 %v119_v41, %v118_v39  ;;  %v106_v56 = vld [vmem:[%s1209_s1 + $0x2e0] sm:$0xff] }
  0x30   :  { %731 = vmatprep.subr.bf16.mxu1 %v730_v26  ;;  %v137_v47 = vld [vmem:[%s1209_s1 + $0x3d8] sm:$0xff]  ;;  %v706_v51 = vpack.c.bf16 %v105_v43, %v104_v42  ;;  %v88_v13 = vld [vmem:[%s1209_s1 + $0x250] sm:$0xff]  ;;  %v107_v57 = vld [vmem:[%s1209_s1 + $0x2e8] sm:$0xff] }
  0x31   :  { %701 = vmatpush3.bf16.msra.mxu0 %v700_v32  ;;  %390 = vmatprep.mubr.f32.mxu0 %v176_v44  ;;  %v177_v49 = vcombine.high %v175_v45, %v175_v45  ;;  %v89_v52 = vld [vmem:[%s1209_s1 + $0x258] sm:$0xff]  ;;  %v120_v53 = vld [vmem:[%s1209_s1 + $0x350] sm:$0xff]  ;;  %v738_v54 = vpack.c.bf16 %v137_v47, %v136_v46  ;;  %v138_v58 = vld [vmem:[%s1209_s1 + $0x3e0] sm:$0xff]  ;;  %v710_v62 = vpack.c.bf16 %v107_v57, %v106_v56 }
  0x32   :  { %703 = vmatprep.subr.bf16.mxu0 %v702_v36  ;;  %v121_v55 = vld [vmem:[%s1209_s1 + $0x358] sm:$0xff]  ;;  %v139_v59 = vld [vmem:[%s1209_s1 + $0x3e8] sm:$0xff]  ;;  %v708_v60 = vpack.c.bf16 %v89_v52, %v88_v13  ;;  %v90_v63 = vld [vmem:[%s1209_s1 + $0x260] sm:$0xff] }
  0x33   :  { %733 = vmatpush3.bf16.msra.mxu1 %v732_v35  ;;  %460 = vmatprep.mubr.f32.mxu1 %v177_v49  ;;  %v740_v61 = vpack.c.bf16 %v121_v55, %v120_v53  ;;  %v91_v0 = vld [vmem:[%s1209_s1 + $0x268] sm:$0xff]  ;;  %v122_v1 = vld [vmem:[%s1209_s1 + $0x360] sm:$0xff]  ;;  %v742_v2 = vpack.c.bf16 %v139_v59, %v138_v58  ;;  %v108_v4 = vld [vmem:[%s1209_s1 + $0x2f0] sm:$0xff] }
  0x34   :  { %735 = vmatprep.subr.bf16.mxu1 %v734_v40  ;;  %v123_v3 = vld [vmem:[%s1209_s1 + $0x368] sm:$0xff]  ;;  %v109_v5 = vld [vmem:[%s1209_s1 + $0x2f8] sm:$0xff]  ;;  %v140_v6 = vld [vmem:[%s1209_s1 + $0x3f0] sm:$0xff]  ;;  %v712_v8 = vpack.c.bf16 %v91_v0, %v90_v63 }
  0x35   :  { %705 = vmatpush3.bf16.msra.mxu0 %v704_v48  ;;  %v141_v7 = vld [vmem:[%s1209_s1 + $0x3f8] sm:$0xff]  ;;  %v744_v9 = vpack.c.bf16 %v123_v3, %v122_v1  ;;  %v714_v10 = vpack.c.bf16 %v109_v5, %v108_v4  ;;  %v92_v11 = vld [vmem:[%s1209_s1 + $0x270] sm:$0xff] }
  0x36   :  { %707 = vmatprep.subr.bf16.mxu0 %v706_v51  ;;  %v93_v12 = vld [vmem:[%s1209_s1 + $0x278] sm:$0xff]  ;;  %v746_v14 = vpack.c.bf16 %v141_v7, %v140_v6  ;;  %v124_v15 = vld [vmem:[%s1209_s1 + $0x370] sm:$0xff] }
  0x37   :  { %737 = vmatpush3.bf16.msra.mxu1 %v736_v50  ;;  %v125_v16 = vld [vmem:[%s1209_s1 + $0x378] sm:$0xff]  ;;  %v716_v17 = vpack.c.bf16 %v93_v12, %v92_v11  ;;  %s779_s1 = smov [#allocation2]  }
  0x38   :  { %739 = vmatprep.subr.bf16.mxu1 %v738_v54  ;;  %v748_v18 = vpack.c.bf16 %v125_v16, %v124_v15  ;;  %s474_s15 = sshll.u32 %s779_s1, 4  ;;  %s475_s15 = int_to_ptr.vmem [resolvable:$true] %s474_s15 }
  0x39   :  { %709 = vmatpush3.bf16.msra.mxu0 %v708_v60  ;;  %s754_s16 = scalar_lea.vmem %s475_s15, 32  ;;  %p759_p1 = scmp.lt.s32.totalorder %s475_s15, %s475_s15 }
  0x3a   :  { %711 = vmatprep.subr.bf16.mxu0 %v710_v62  ;;  %p755_p0 = scmp.ne.s32.totalorder %s475_s15, %s754_s16  ;;  %p760_p2 = scmp.lt.s32.totalorder %s754_s16, %s754_s16 }
  0x3b   :  { %741 = vmatpush3.bf16.msra.mxu1 %v740_v61 }
  0x3c   :  { %743 = vmatprep.subr.bf16.mxu1 %v742_v2  ;;  %p761_p3 = por %p760_p2, %p759_p1 }
  0x3d   :  { %713 = vmatpush3.bf16.msra.mxu0 %v712_v8 }
  0x3e   :  { %715 = vmatprep.subr.bf16.mxu0 %v714_v10  ;;  %p762_p4 = pnand %p761_p3, %p755_p0 }
  0x3f   :  { %745 = vmatpush3.bf16.msra.mxu1 %v744_v9 }
  0x40   :  { %747 = vmatprep.subr.bf16.mxu1 %v746_v14 }
  0x41   :  { %717 = vmatpush3.bf16.msra.mxu0 %v716_v17 }
  0x43   :  { %749 = vmatpush3.bf16.msra.mxu1 %v748_v18 }
  0x44   :  { %391 = vmatmul.mubr.f32.vlgmr.msra.gmra.mrb[2].mxu0 %v1106_v33 }
  0x46   :  { %461 = vmatmul.mubr.f32.vlgmr.msra.gmra.mrb[2].mxu1 %v175_v45 }
  0xf7   :  { %v514_v19 = vpop.f32.mrb[0].mxu0 }
  0xf8   :  { %v515_v20 = vpop.f32.mrb[1].mxu0 }
  0xf9   :  { %v549_v21 = vpop.f32.mrb[0].mxu1  ;;  %v516_v22 = vadd.f32 %v515_v20, %v514_v19 }
  0xfa   :  { %v550_v23 = vpop.f32.mrb[1].mxu1 }
  0xfb   :  { %v551_v24 = vadd.f32 %v550_v23, %v549_v21  ;;  %v253_v25 = vadd.f32 1.0, %v516_v22 }
  0xfd   :  { %v323_v26 = vadd.f32 %v551_v24, %v253_v25 }
 0x117   :  { %v584_v27 = vpop.f32.mrb[2].mxu0 }
 0x118   :  { %v585_v28 = vpop.f32.mrb[3].mxu0 }
 0x119   :  { %v619_v29 = vpop.f32.mrb[2].mxu1  ;;  %v586_v30 = vadd.f32 %v585_v28, %v584_v27 }
 0x11a   :  { %v620_v31 = vpop.f32.mrb[3].mxu1 }
 0x11b   :  { %v621_v32 = vadd.f32 %v620_v31, %v619_v29  ;;  %v393_v34 = vadd.f32 %v586_v30, %v323_v26 }
 0x11d   :  { %v463_v33 = vadd.f32 %v621_v32, %v393_v34 }
 0x11f   :  { %467 = vst.msk [vmem:[#allocation2] sm:$0x3] %vm466_vm0, %v463_v33 }
 0x120   :  { %765 = shalt.err (!%p762_p4)
}
 0x121   :  { %s766_s19 = scalar_lea.hbm %s1210_s2, 32 }
 0x122   :  { %p767_p5 = scmp.ne.s32.totalorder %s1210_s2, %s766_s19  ;;  %p770_p6 = scmp.lt.u32.totalorder %s766_s19, %s1210_s2 }
 0x124   :  { %p772_p7 = pnand %p770_p6, %p767_p5 }
 0x126   :  { %775 = shalt.err (!%p772_p7)
}
 0x127   :  { %477 = dma.vmem_to_hbm [thread:$0]  %s475_s15, 32, %s1210_s2, [#allocation3]  }
 0x128   :  { %776 = dma.done.wait [#allocation3], 32  }
 0x129   :  { %777 = vsyncadd [#allocation3], 4294967264 }
 0x12a   :  { %481 = vsyncpa [#allocation3], 1 }

</bundles_post_ra>
